<compile_context>
chip_gen: v7x
topology: tpu7x:2x2x1
jax: 0.10.0
libtpu: 0.0.40
codegen_flags: <defaults>
</compile_context>

<pallas_src>
import functools

import jax
import jax.numpy as jnp
from jax import lax
from jax.experimental import pallas as pl
from jax.experimental.pallas import tpu as pltpu

GROUPS = 8
EPS = 1e-5

# taps in (dy, dx) order matching the (ky*3 + kx) weight column layout (ky = dy+1, kx = dx+1)
_TAPS = tuple((dy, dx) for dy in (-1, 0, 1) for dx in (-1, 0, 1))


@functools.lru_cache(maxsize=None)
def _roll_matches_jnp():
    """One-time probe of pltpu.roll's rotation direction (result cached).

    Returns True iff pltpu.roll(x, s, axis)[..., i] == x[..., (i - s) % n]
    (the jnp.roll convention).  The static tap shifts below are derived from this,
    so the conv is correct under either rotation convention.
    """
    def k(x_ref, o_ref):
        o_ref[...] = pltpu.roll(x_ref[...], 1, 1)

    x = jnp.tile(jnp.arange(128, dtype=jnp.float32)[None, :], (8, 1))
    y = pl.pallas_call(k, out_shape=jax.ShapeDtypeStruct((8, 128), jnp.float32))(x)
    first = float(y[0, 0])
    if first == 127.0:
        return True
    if first == 1.0:
        return False
    raise AssertionError(f"unexpected pltpu.roll behaviour: out[0,0]={first}")


def _volume2plane_kernel(x_ref, m_ref, w_ref, v_ref, p_ref, o_ref, col_ref,
                         *, W, HW, bc, layers, zero_fill, roll_like_jnp):
    """Fused Volume2Plane forward for one chunk of `bc` images.

    Activations live as (C, bc*HW) f32 (lane-dense); im2col scratch `col_ref` is bf16.
    V packing: 0..3 = conv biases, 4..6 = GN gammas, 7..9 = GN betas; P: group-avg mats.
    """
    N = bc * HW
    masks = m_ref[...]                                   # (9, 1, N) f32 per-tap validity

    if zero_fill:
        # Only needed when layers have differing K (unused col rows must not hold
        # uninitialized bits that could be NaN; padded weight cols are zero anyway).
        col_ref[...] = jnp.zeros(col_ref.shape, col_ref.dtype)

    def conv3x3(h, layer, cin, cout):
        # h: (cin, N) f32.  Build im2col directly in the bf16 VMEM scratch:
        # per tap one XLU lane-roll, mask multiply fused with the bf16 cast, one store.
        for t, (dy, dx) in enumerate(_TAPS):
            d = dy * W + dx                              # flattened shift: col[p] = h[p + d]
            if d == 0:
                tap = h                                  # center tap: no shift, no mask
            else:
                shift = (N - d) % N if roll_like_jnp else d % N
                tap = pltpu.roll(h, shift, 1) * masks[t]
            col_ref[pl.ds(t * cin, cin), :] = tap.astype(jnp.bfloat16)
        # ONE MXU matmul per conv: (Cmax, Kmax)bf16 @ (Kmax, N)bf16 -> f32 accumulate.
        acc = jnp.dot(w_ref[layer], col_ref[...],
                      preferred_element_type=jnp.float32)        # (Cmax, N)
        return acc[:cout] + v_ref[layer][:cout]          # drop padded rows, add bias

    def gn_silu(h, layer, c):
        # GroupNorm(GROUPS) + SiLU with per-image statistics (reduce-then-combine):
        # exact f32 lane reductions, then the tiny (c,c) group-average matrix applied
        # to the (c,1) sums.  No full-width stat matmuls.
        gamma = v_ref[3 + layer][:c]                     # (c, 1)
        beta = v_ref[6 + layer][:c]                      # (c, 1)
        P = p_ref[layer - 1][:c, :c]                     # (c, c) group-average weights
        outs = []
        for ib in range(bc):
            hb = h[:, ib * HW:(ib + 1) * HW]             # static lane slice: one image
            s = jnp.sum(hb, axis=1, keepdims=True)                       # (c, 1) f32
            sq = jnp.sum(hb * hb, axis=1, keepdims=True)                 # (c, 1) f32
            mean = jnp.dot(P, s, preferred_element_type=jnp.float32)     # per-group mean
            msq = jnp.dot(P, sq, preferred_element_type=jnp.float32)     # per-group E[x^2]
            var = jnp.maximum(msq - mean * mean, 0.0)    # clamp one-pass variance
            y = (hb - mean) * (lax.rsqrt(var + EPS) * gamma) + beta
            outs.append(y * jax.nn.sigmoid(y))           # SiLU
        return outs[0] if bc == 1 else jnp.concatenate(outs, axis=1)

    # Assemble the chunk as (cin, bc*HW): lane concat at HW-aligned boundaries.
    if bc == 1:
        h = x_ref[0].astype(jnp.float32)
    else:
        h = jnp.concatenate([x_ref[ib].astype(jnp.float32) for ib in range(bc)], axis=1)

    (c0i, c0o), (c1i, c1o), (c2i, c2o), (c3i, c3o) = layers
    h = conv3x3(h, 0, c0i, c0o)                                      # init_conv
    h = conv3x3(gn_silu(h, 1, c1i), 1, c1i, c1o)                     # out_conv0 (1st conv)
    h = conv3x3(gn_silu(h, 2, c2i), 2, c2i, c2o)                     # out_conv0 (2nd conv)
    h = conv3x3(gn_silu(h, 3, c3i), 3, c3i, c3o)                     # final_out

    for ib in range(bc):
        o_ref[ib] = h[:, ib * HW:(ib + 1) * HW].astype(o_ref.dtype)


# ------------------------------ wrapper-side packing ------------------------------

def _round_up(x, m):
    return ((x + m - 1) // m) * m


def _pack_conv_w(w_hwio, cin_pad, cout_pad, k_pad):
    # HWIO (3,3,Cin,Cout) -> (Cout_pad, K_pad) bf16, column order (ky*3+kx)*Cin_pad + ci.
    kh, kw, cin, cout = w_hwio.shape
    if cin_pad > cin:
        w_hwio = jnp.pad(w_hwio, ((0, 0), (0, 0), (0, cin_pad - cin), (0, 0)))
    w = jnp.transpose(w_hwio, (3, 0, 1, 2)).reshape(cout, kh * kw * cin_pad)
    w = jnp.pad(w, ((0, cout_pad - cout), (0, k_pad - kh * kw * cin_pad)))
    return w.astype(jnp.bfloat16)


def _colpad(v, cmax):
    v = jnp.asarray(v, jnp.float32).reshape(-1)
    return jnp.pad(v, (0, cmax - v.shape[0])).reshape(cmax, 1)


def _group_avg_matrix(c, hw, cmax, groups=GROUPS):
    # P such that P @ (per-channel sums) gives the per-group mean broadcast per channel.
    cg = c // groups
    gid = jnp.arange(c) // cg
    p = (gid[:, None] == gid[None, :]).astype(jnp.float32) / jnp.float32(hw * cg)
    return jnp.pad(p, ((0, cmax - c), (0, cmax - c)))


def _tap_masks(h, w):
    # (9, 1, H*W) f32: valid-position mask per 3x3 tap (replaces zero padding entirely).
    yy, xx = jnp.meshgrid(jnp.arange(h), jnp.arange(w), indexing="ij")
    ms = []
    for dy, dx in _TAPS:
        valid = (yy + dy >= 0) & (yy + dy < h) & (xx + dx >= 0) & (xx + dx < w)
        ms.append(valid.reshape(1, h * w))
    return jnp.stack(ms, axis=0).astype(jnp.float32)


def _pick_bc(B, HW, cin_p, out_dim, cmax, kmax, max_bc=8):
    # Conservative ~6 MiB live-set budget so the chunk fits v7x (64 MiB physical /
    # 32 MiB default scoped VMEM) as well as v5e/v6e, with double-buffered IO blocks.
    budget = 6 * 1024 * 1024

    def est(bc):
        n = bc * HW
        return n * (kmax * 2              # bf16 im2col scratch
                    + 4 * cmax * 4        # f32 activation working set (rough)
                    + 9 * 4               # tap masks
                    + 2 * cin_p * 2       # double-buffered bf16 input block
                    + 2 * out_dim * 4)    # double-buffered f32 output block

    bc = 1
    for cand in range(1, min(B, max_bc) + 1):
        if B % cand:
            continue
        if est(cand) > budget:
            continue
        if B > 1 and B // cand < 2:       # keep grid >= 2 so v7x megacore stays busy
            continue
        bc = cand
    return bc


def volume2plane_forward(x_nchw, p):
    """Matches Volume2Plane.forward. x_nchw: (B, in_dim, H, W) like PyTorch."""
    B, cin, H, W = x_nchw.shape
    HW = H * W

    d0 = p["w0"].shape[-1]
    d1 = p["w1"].shape[-1]
    out_dim = p["w3"].shape[-1]
    assert d0 % GROUPS == 0 and d1 % GROUPS == 0

    cin_p = _round_up(cin, 16)                       # K = 9*cin_p multiple of 16 (bf16 pack)
    cmax = _round_up(max(d0, d1, out_dim), 8)        # common padded Cout for stacked params
    ks = (9 * cin_p, 9 * d0, 9 * d1, 9 * d1)
    kmax = max(ks)
    zero_fill = len(set(ks)) > 1

    bc = _pick_bc(B, HW, cin_p, out_dim, cmax, kmax)
    num_chunks = B // bc
    N = bc * HW

    # Lane-dense layout: NCHW reshape with H*W on the lane axis; bf16 DMA payload;
    # zero-pad input channels up to cin_p (matching zero weight columns below).
    x = x_nchw.astype(jnp.bfloat16).reshape(B, cin, HW)
    if cin_p > cin:
        x = jnp.pad(x, ((0, 0), (0, cin_p - cin), (0, 0)))

    masks = jnp.tile(_tap_masks(H, W), (1, 1, bc))                       # (9, 1, N)

    w_all = jnp.stack([
        _pack_conv_w(p["w0"], cin_p, cmax, kmax),
        _pack_conv_w(p["w1"], d0, cmax, kmax),
        _pack_conv_w(p["w2"], d1, cmax, kmax),
        _pack_conv_w(p["w3"], d1, cmax, kmax),
    ])                                                                   # (4, cmax, kmax) bf16
    v_all = jnp.stack([_colpad(p[k], cmax) for k in
                       ("b0", "b1", "b2", "b3",
                        "g1", "g2", "g3",
                        "be1", "be2", "be3")])                           # (10, cmax, 1) f32
    p_all = jnp.stack([_group_avg_matrix(d0, HW, cmax),
                       _group_avg_matrix(d1, HW, cmax),
                       _group_avg_matrix(d1, HW, cmax)])                 # (3, cmax, cmax) f32

    kern = functools.partial(
        _volume2plane_kernel, W=W, HW=HW, bc=bc,
        layers=((cin_p, d0), (d0, d1), (d1, d1), (d1, out_dim)),
        zero_fill=zero_fill, roll_like_jnp=_roll_matches_jnp())

    const3 = lambda b: (0, 0, 0)

    out = pl.pallas_call(
        kern,
        out_shape=jax.ShapeDtypeStruct((B, out_dim, HW), jnp.float32),
        grid=(num_chunks,),
        in_specs=[
            pl.BlockSpec((bc, cin_p, HW), lambda b: (b, 0, 0)),
            pl.BlockSpec(masks.shape, const3),
            pl.BlockSpec(w_all.shape, const3),
            pl.BlockSpec(v_all.shape, const3),
            pl.BlockSpec(p_all.shape, const3),
        ],
        out_specs=pl.BlockSpec((bc, out_dim, HW), lambda b: (b, 0, 0)),
        scratch_shapes=[pltpu.VMEM((kmax, N), jnp.bfloat16)],            # shared im2col buffer
        compiler_params=pltpu.CompilerParams(
            dimension_semantics=("parallel",),
            vmem_limit_bytes=32 * 1024 * 1024),
    )(x, masks, w_all, v_all, p_all)

    return out.reshape(B, out_dim, H, W)


# ------------------------------ params & reference ------------------------------

def init_params(key, in_dim, hidden_dims, out_dim):
    d0, d1, d2, d3 = hidden_dims
    # forward() only works when out_conv0's output channels (d1) match final_out's GroupNorm dim (d3)
    assert d1 == d3
    keys = jax.random.split(key, 8)

    def conv_init(k, cin, cout):
        scale = 1.0 / jnp.sqrt(jnp.float32(cin * 9))
        w = scale * jax.random.normal(k, (3, 3, cin, cout), jnp.float32)   # HWIO
        bb = 0.01 * jax.random.normal(jax.random.fold_in(k, 1), (cout,), jnp.float32)
        return w, bb

    def gn_init(k, c):
        g = 1.0 + 0.1 * jax.random.normal(k, (c,), jnp.float32)
        be = 0.1 * jax.random.normal(jax.random.fold_in(k, 1), (c,), jnp.float32)
        return g, be

    p = {}
    p["w0"], p["b0"] = conv_init(keys[0], in_dim, d0)
    p["g1"], p["be1"] = gn_init(keys[1], d0)
    p["w1"], p["b1"] = conv_init(keys[2], d0, d1)
    p["g2"], p["be2"] = gn_init(keys[3], d1)
    p["w2"], p["b2"] = conv_init(keys[4], d1, d1)
    p["g3"], p["be3"] = gn_init(keys[5], d3)
    p["w3"], p["b3"] = conv_init(keys[6], d3, out_dim)
    return p


def ref_forward(x_nchw, p, G=GROUPS):
    """Pure-JAX reference for correctness checking."""
    x = jnp.transpose(x_nchw, (0, 2, 3, 1))

    def conv(x, w, bb):
        y = lax.conv_general_dilated(
            x, w, (1, 1), "SAME",
            dimension_numbers=("NHWC", "HWIO", "NHWC"),
            precision=lax.Precision.HIGHEST)
        return y + bb.reshape(1, 1, 1, -1)

    def gnsilu(x, g, be):
        B, H, W, C = x.shape
        xr = x.reshape(B, H, W, G, C // G)
        m = xr.mean(axis=(1, 2, 4), keepdims=True)
        v = ((xr - m) ** 2).mean(axis=(1, 2, 4), keepdims=True)
        y = ((xr - m) / jnp.sqrt(v + EPS)).reshape(B, H, W, C)
        y = y * g.reshape(1, 1, 1, -1) + be.reshape(1, 1, 1, -1)
        return y * jax.nn.sigmoid(y)

    h = conv(x, p["w0"], p["b0"])
    h = conv(gnsilu(h, p["g1"], p["be1"]), p["w1"], p["b1"])
    h = conv(gnsilu(h, p["g2"], p["be2"]), p["w2"], p["b2"])
    h = conv(gnsilu(h, p["g3"], p["be3"]), p["w3"], p["b3"])
    return jnp.transpose(h, (0, 3, 1, 2))


if __name__ == "__main__":
    key = jax.random.PRNGKey(0)
    B, in_dim, H, W = 4, 8, 16, 16          # B=4 -> bc=2 images per grid step, grid=2
    hidden_dims = (16, 16, 16, 16)          # (d0, d1, d2, d3); d2 unused, d1 == d3 required
    out_dim = 8

    kx, kp = jax.random.split(key)
    x = jax.random.normal(kx, (B, in_dim, H, W), jnp.float32)   # PyTorch NCHW input
    params = init_params(kp, in_dim, hidden_dims, out_dim)

    y = volume2plane_forward(x, params)
    y = jax.block_until_ready(y)
    assert y.shape == (B, out_dim, H, W)

    y_ref = ref_forward(x, params)
    max_err = float(jnp.max(jnp.abs(y - y_ref)))
    # Conv matmuls use bf16 MXU operands with f32 accumulation across 4 stacked convs, so
    # the comparison against the f32/HIGHEST reference uses a bf16-level tolerance.
    assert jnp.allclose(y, y_ref, atol=3e-2, rtol=3e-2), f"max abs err {max_err}"

    print("KERNEL_OK")
</pallas_src>

<mosaic_0001>
module attributes {stable_mosaic.version = 11 : i64} {
  func.func @k(%arg0: memref<8x128xf32, #tpu.memory_space<vmem>>, %arg1: memref<8x128xf32, #tpu.memory_space<vmem>>) attributes {dimension_semantics = [], scalar_prefetch = 0 : i64, scratch_operands = 0 : i64, tpu.core_type = #tpu.core_type<tc>} {
    %c0 = arith.constant 0 : index
    %c0_0 = arith.constant 0 : index
    %0 = vector.load %arg0[%c0, %c0_0] : memref<8x128xf32, #tpu.memory_space<vmem>>, vector<8x128xf32>
    %c1_i32 = arith.constant 1 : i32
    %1 = tpu.dynamic_rotate %0 by %c1_i32 dim 1 : vector<8x128xf32>, i32 -> vector<8x128xf32>
    %c0_1 = arith.constant 0 : index
    %c0_2 = arith.constant 0 : index
    %2 = vector.load %arg1[%c0_1, %c0_2] : memref<8x128xf32, #tpu.memory_space<vmem>>, vector<8x128xf32>
    tpu.vector_store %arg1[%c0_1, %c0_2], %1 {strides = array<i32>} : memref<8x128xf32, #tpu.memory_space<vmem>>, vector<8x128xf32>,
    return
  }
}

</mosaic_0001>

<bundles_post_ra>
// kernel: tpu_custom_call.1
= control target key start
LH: loop header
LB: loop body
LE: loop exit
PB: predicated region body
PF: predicated region fallthrough
CT: control target
= control target key end

     0   :  { %6 = vsyncpa [#allocation3], 0  ;;  %s128_s0 = inlined_call_operand.hbm [shape: f32[8,128], index: 0, kind: input, shape index: {}]   ;;  %s129_s1 = inlined_call_operand.hbm [shape: f32[8,128], index: 1, kind: output, shape index: {}]  }
   0x1   :  { %7 = vsyncpa [#allocation4], 0  ;;  %s91_s6 = smov [#allocation2]   ;;  %s43_s10 = scalar_lea.hbm %s128_s0, 128 }
   0x2   :  { %s14_s7 = sshll.u32 %s91_s6, 4  ;;  %p44_p0 = scmp.ne.s32.totalorder %s128_s0, %s43_s10  ;;  %s15_s7 = int_to_ptr.vmem [resolvable:$true] %s14_s7 }
   0x3   :  { %p47_p1 = scmp.lt.u32.totalorder %s43_s10, %s128_s0 }
   0x5   :  { %p49_p2 = pnand %p47_p1, %p44_p0 }
   0x7   :  { %52 = shalt.err (!%p49_p2)
}
   0x8   :  { %s53_s15 = scalar_lea.vmem %s15_s7, 128  ;;  %p58_p4 = scmp.lt.s32.totalorder %s15_s7, %s15_s7 }
   0x9   :  { %p54_p3 = scmp.ne.s32.totalorder %s15_s7, %s53_s15  ;;  %p59_p5 = scmp.lt.s32.totalorder %s53_s15, %s53_s15 }
   0xb   :  { %p60_p6 = por %p59_p5, %p58_p4 }
   0xd   :  { %p61_p7 = pnand %p60_p6, %p54_p3 }
   0xf   :  { %64 = shalt.err (!%p61_p7)
}
  0x10   :  { %17 = dma.hbm_to_vmem [thread:$0]  %s128_s0, 128, %s15_s7, [#allocation3]  }
  0x11   :  { %87 = dma.done.wait [#allocation3], 128  }
  0x12   :  { %88 = vsyncadd [#allocation3], 4294967168  ;;  %v21_v0 = vld [vmem:[#allocation2] sm:$0xff]  ;;  %s92_s18 = smov 1   ;;  %s93_s19 = smov [#allocation5]  }
  0x13   :  { %22 = vrot.lane.b32.xlu0 %v21_v0, %s92_s18  ;;  %s31_s20 = sshll.u32 %s93_s19, 4  ;;  %s32_s20 = int_to_ptr.vmem [resolvable:$true] %s31_s20 }
  0x14   :  { %s65_s21 = scalar_lea.vmem %s32_s20, 128  ;;  %p70_p9 = scmp.lt.s32.totalorder %s32_s20, %s32_s20 }
  0x15   :  { %p66_p8 = scmp.ne.s32.totalorder %s32_s20, %s65_s21  ;;  %p71_p10 = scmp.lt.s32.totalorder %s65_s21, %s65_s21 }
  0x17   :  { %p72_p11 = por %p71_p10, %p70_p9 }
  0x19   :  { %p73_p12 = pnand %p72_p11, %p66_p8 }
  0x85   :  { %v23_v1 = vpop.permute.xlu0 %22 }
  0x86   :  { %24 = vst [vmem:[#allocation5] sm:$0xff] %v23_v1 }
  0x87   :  { %76 = shalt.err (!%p73_p12)
}
  0x88   :  { %s77_s0 = scalar_lea.hbm %s129_s1, 128 }
  0x89   :  { %p78_p13 = scmp.ne.s32.totalorder %s129_s1, %s77_s0  ;;  %p81_p0 = scmp.lt.u32.totalorder %s77_s0, %s129_s1 }
  0x8b   :  { %p83_p1 = pnand %p81_p0, %p78_p13 }
  0x8d   :  { %86 = shalt.err (!%p83_p1)
}
  0x8e   :  { %34 = dma.vmem_to_hbm [thread:$0]  %s32_s20, 128, %s129_s1, [#allocation4]  }
  0x8f   :  { %89 = dma.done.wait [#allocation4], 128  }
  0x90   :  { %90 = vsyncadd [#allocation4], 4294967168 }
  0x91   :  { %38 = vsyncpa [#allocation3], 1 }
  0x92   :  { %39 = vsyncpa [#allocation4], 1 }

</bundles_post_ra>
